<compile_context>
chip_gen: v7x
topology: tpu7x:2x2x1
jax: 0.10.0
libtpu: 0.0.40
codegen_flags: <defaults>
</compile_context>

<pallas_src>
import functools

import jax
import jax.numpy as jnp
import numpy as np
from jax.experimental import pallas as pl
from jax.experimental.pallas import tpu as pltpu


def _round_up(x, m):
    return ((x + m - 1) // m) * m


def _vmem_bytes_estimate(n_atoms, feat, c, tp):
    """Rough f32 VMEM footprint for a given pair-tile size."""
    f32 = 4
    const = f32 * (
        2 * n_atoms * feat          # q blocks (double-buffered)
        + 2 * feat * c              # W_cat blocks
        + 2 * n_atoms * 3 * c       # mu blocks
        + 2 * n_atoms * 3 * c       # resident output
        + n_atoms * c               # qi scratch
        + n_atoms * 3 * c           # scatter matmul result temp
    )
    per_tp = f32 * (
        4 * n_atoms                 # one-hots / iotas ([TP, A] + [A, TP])
        + 4 * c                     # qj + qj3
        + 2 * 128                   # idx_j block (lane-padded to 128), x2 buffers
        + 2 * 128                   # rv block (lane-padded to 128), x2 buffers
        + 2 * 8                     # idx_i block, x2 buffers
    )
    return const + per_tp * tp


def _dipole_update_kernel(q_ref, w_ref, idx_i_ref, idx_j_ref, rv_ref, mu_ref,
                          out_ref, qi_scratch, *, compute_dtype):
    # q_ref   [A, F]         w_ref   [F, C]         (C = NF*F)
    # idx_i   [1, TP] i32    idx_j   [TP, 1] i32    rv_ref [TP, 3] f32 (= rcut*v)
    # mu_ref  [A, 3C]        out_ref [A, 3C]        qi_scratch [A, C]
    n_atoms = q_ref.shape[0]
    tp = idx_j_ref.shape[0]
    t = pl.program_id(0)

    @pl.when(t == 0)
    def _init():
        # Dense (bias=False) for every field at once; cached across pair tiles.
        qi_scratch[...] = jnp.dot(q_ref[...], w_ref[...],
                                  preferred_element_type=jnp.float32)
        out_ref[...] = mu_ref[...]

    # ---- gather qj = qi[idx_j] as a one-hot matmul: [TP, A] @ [A, C] --------
    lane_atoms = jax.lax.broadcasted_iota(jnp.int32, (tp, n_atoms), 1)
    onehot_j = (idx_j_ref[...] == lane_atoms).astype(compute_dtype)      # [TP, A]
    qj = jnp.dot(onehot_j, qi_scratch[...].astype(compute_dtype),
                 preferred_element_type=jnp.float32)                     # [TP, C]

    # ---- fold rcut * v_d into the gathered features along lanes -------------
    rv = rv_ref[...]                                                     # [TP, 3]
    qj3 = jnp.concatenate([qj * rv[:, d:d + 1] for d in range(3)],
                          axis=1)                                        # [TP, 3C]

    # ---- scatter-add over atoms i: a single [A, TP] one-hot matmul ----------
    sub_atoms = jax.lax.broadcasted_iota(jnp.int32, (n_atoms, tp), 0)
    onehot_i = (sub_atoms == idx_i_ref[...]).astype(compute_dtype)       # [A, TP]
    out_ref[...] += jnp.dot(onehot_i, qj3.astype(compute_dtype),
                            preferred_element_type=jnp.float32)


@functools.partial(jax.jit, static_argnames=("fields", "use_bf16"))
def _dipole_update_impl(q, mu, v_ij, idx_i, idx_j, rcut_ij, weights, *,
                        fields, use_bf16=False):
    n_atoms, _, feat = q.shape
    nf = len(fields)
    c = nf * feat
    n_pairs = idx_i.shape[0]

    # ---- VMEM-budget-derived pair tile (carries across v5e / v6e / v7x) -----
    try:
        vmem_capacity = int(pltpu.get_tpu_info().vmem_capacity_bytes)
    except Exception:
        vmem_capacity = 64 * 2 ** 20           # v7x-safe fallback
    vmem_budget = (3 * vmem_capacity) // 4     # ~48 MiB on v7x, ~96 MiB on v5e/v6e

    p_ceil = _round_up(max(n_pairs, 1), 128)
    tp = 128
    for cand in (256, 512, 1024, 2048):
        if cand <= p_ceil and 2 * _vmem_bytes_estimate(n_atoms, feat, c, cand) <= vmem_budget:
            tp = cand
    p_pad = _round_up(max(n_pairs, 1), tp)
    pad = p_pad - n_pairs

    q2d = q.reshape(n_atoms, feat).astype(jnp.float32)
    w_cat = jnp.concatenate([weights[f].astype(jnp.float32) for f in fields],
                            axis=1)                                      # [F, C]
    # [A, 3, C] -> free row-major reshape into the atom-major output layout.
    mu_flat = jnp.concatenate([mu[f].astype(jnp.float32) for f in fields],
                              axis=-1).reshape(n_atoms, 3 * c)           # [A, 3C]

    # Lane/sublane-oriented pair arrays, padded with rcut = 0 (=> rv rows 0).
    idx_i_l = jnp.pad(idx_i.astype(jnp.int32), (0, pad)).reshape(1, p_pad)
    idx_j_s = jnp.pad(idx_j.astype(jnp.int32), (0, pad)).reshape(p_pad, 1)
    rv = jnp.pad(rcut_ij.astype(jnp.float32)[:, None] * v_ij.astype(jnp.float32),
                 ((0, pad), (0, 0)))                                     # [P_pad, 3]

    kernel = functools.partial(
        _dipole_update_kernel,
        compute_dtype=jnp.bfloat16 if use_bf16 else jnp.float32)

    out_flat = pl.pallas_call(
        kernel,
        out_shape=jax.ShapeDtypeStruct((n_atoms, 3 * c), jnp.float32),
        grid=(p_pad // tp,),
        in_specs=[
            pl.BlockSpec((n_atoms, feat), lambda t: (0, 0)),     # q
            pl.BlockSpec((feat, c), lambda t: (0, 0)),           # W_cat
            pl.BlockSpec((1, tp), lambda t: (0, t)),             # idx_i (lanes)
            pl.BlockSpec((tp, 1), lambda t: (t, 0)),             # idx_j (sublanes)
            pl.BlockSpec((tp, 3), lambda t: (t, 0)),             # rv = rcut * v
            pl.BlockSpec((n_atoms, 3 * c), lambda t: (0, 0)),    # mu (aliased)
        ],
        out_specs=pl.BlockSpec((n_atoms, 3 * c), lambda t: (0, 0)),
        scratch_shapes=[pltpu.VMEM((n_atoms, c), jnp.float32)],
        input_output_aliases={5: 0},
        compiler_params=pltpu.CompilerParams(
            dimension_semantics=("arbitrary",),
            vmem_limit_bytes=int(vmem_budget),
        ),
    )(q2d, w_cat, idx_i_l, idx_j_s, rv, mu_flat)

    out3 = out_flat.reshape(n_atoms, 3, c)
    return {f: out3[..., i * feat:(i + 1) * feat] for i, f in enumerate(fields)}


def dipole_update(q, mu, v_ij, idx_i, idx_j, rcut_ij, weights, use_bf16=False):
    """Pallas implementation of DipoleUpdate.forward.

    q       : [n_atoms, 1, F]
    mu      : dict field -> [n_atoms, 3, F]
    v_ij    : [n_pairs, 3]
    idx_i/j : [n_pairs] int
    rcut_ij : [n_pairs]
    weights : dict field -> [F, F]  (applied as q @ W)
    returns : dict field -> [n_atoms, 3, F] (updated mu)
    """
    fields = tuple(weights.keys())
    return _dipole_update_impl(q, mu, v_ij, idx_i, idx_j, rcut_ij, weights,
                               fields=fields, use_bf16=use_bf16)


def dipole_update_reference(q, mu, v_ij, idx_i, idx_j, rcut_ij, weights):
    """Pure-JAX reference matching the PyTorch semantics."""
    out = {}
    n_atoms = q.shape[0]
    feat = q.shape[-1]
    for field, w in weights.items():
        qi = jnp.einsum("aof,fg->aog", q, w)                     # [A, 1, F]
        qj = qi[idx_j]                                           # [P, 1, F]
        dmu_ij = qj * rcut_ij[:, None, None] * v_ij[:, :, None]  # [P, 3, F]
        dmu_i = jnp.zeros((n_atoms, 3, feat), jnp.float32).at[idx_i].add(dmu_ij)
        out[field] = mu[field] + dmu_i
    return out


if __name__ == "__main__":
    external_fields = ["electric_field", "magnetic_field"]
    n_atoms = 8
    n_atom_basis = 32
    n_pairs = 16

    key = jax.random.PRNGKey(0)
    k_q, k_mu, k_v, k_rc, k_i, k_j, k_w = jax.random.split(key, 7)

    q = jax.random.normal(k_q, (n_atoms, 1, n_atom_basis), jnp.float32)
    mu = {}
    mu_keys = jax.random.split(k_mu, len(external_fields))
    for f, kk in zip(external_fields, mu_keys):
        mu[f] = jax.random.normal(kk, (n_atoms, 3, n_atom_basis), jnp.float32)
    v_ij = jax.random.normal(k_v, (n_pairs, 3), jnp.float32)
    rcut_ij = jax.random.uniform(k_rc, (n_pairs,), jnp.float32)
    idx_i = jax.random.randint(k_i, (n_pairs,), 0, n_atoms, jnp.int32)
    idx_j = jax.random.randint(k_j, (n_pairs,), 0, n_atoms, jnp.int32)

    # Deterministic parameter init (Dense, bias=False): one [F, F] weight per field.
    weights = {}
    w_keys = jax.random.split(k_w, len(external_fields))
    for f, kk in zip(external_fields, w_keys):
        scale = 1.0 / np.sqrt(n_atom_basis)
        weights[f] = jax.random.uniform(
            kk, (n_atom_basis, n_atom_basis), jnp.float32, -scale, scale)

    result = dipole_update(q, mu, v_ij, idx_i, idx_j, rcut_ij, weights)
    result = jax.tree_util.tree_map(jax.block_until_ready, result)

    ref = dipole_update_reference(q, mu, v_ij, idx_i, idx_j, rcut_ij, weights)
    for f in external_fields:
        np.testing.assert_allclose(np.asarray(result[f]), np.asarray(ref[f]),
                                   rtol=1e-5, atol=1e-5)

    print("KERNEL_OK")
</pallas_src>

<mosaic_0001>
module attributes {stable_mosaic.version = 11 : i64} {
  func.func @_dipole_update_kernel(%arg0: i32, %arg1: memref<8x32xf32, #tpu.memory_space<vmem>>, %arg2: memref<32x64xf32, #tpu.memory_space<vmem>>, %arg3: memref<1x128xi32, #tpu.memory_space<vmem>>, %arg4: memref<128x1xi32, #tpu.memory_space<vmem>>, %arg5: memref<128x3xf32, #tpu.memory_space<vmem>>, %arg6: memref<8x192xf32, #tpu.memory_space<vmem>>, %arg7: memref<8x192xf32, #tpu.memory_space<vmem>>, %arg8: memref<8x64xf32, #tpu.memory_space<vmem>>) attributes {dimension_semantics = [#tpu.dimension_semantics<arbitrary>], iteration_bounds = array<i64: 1>, scalar_prefetch = 0 : i64, scratch_operands = 1 : i64, tpu.core_type = #tpu.core_type<tc>, window_params = [{pipeline_mode = #tpu.pipeline_mode<synchronous>, transform_indices = @transform_0, window_bounds = array<i64: 8, 32>}, {pipeline_mode = #tpu.pipeline_mode<synchronous>, transform_indices = @transform_1, window_bounds = array<i64: 32, 64>}, {transform_indices = @transform_2, window_bounds = array<i64: 1, 128>}, {transform_indices = @transform_3, window_bounds = array<i64: 128, 1>}, {transform_indices = @transform_4, window_bounds = array<i64: 128, 3>}, {pipeline_mode = #tpu.pipeline_mode<synchronous>, transform_indices = @transform_5, window_bounds = array<i64: 8, 192>}, {pipeline_mode = #tpu.pipeline_mode<synchronous>, transform_indices = @transform_6, window_bounds = array<i64: 8, 192>}]} {
    %c0_i32 = arith.constant 0 : i32
    %0 = arith.cmpi eq, %arg0, %c0_i32 : i32
    %1 = arith.extui %0 : i1 to i32
    %c0_i32_0 = arith.constant 0 : i32
    %2 = arith.cmpi ne, %1, %c0_i32_0 : i32
    scf.if %2 {
      %c0_13 = arith.constant 0 : index
      %c0_14 = arith.constant 0 : index
      %32 = vector.load %arg1[%c0_13, %c0_14] : memref<8x32xf32, #tpu.memory_space<vmem>>, vector<8x32xf32>
      %c0_15 = arith.constant 0 : index
      %c0_16 = arith.constant 0 : index
      %33 = vector.load %arg2[%c0_15, %c0_16] : memref<32x64xf32, #tpu.memory_space<vmem>>, vector<32x64xf32>
      %cst_17 = arith.constant dense<0.000000e+00> : vector<8x64xf32>
      %34 = tpu.matmul %32, %33, %cst_17 {dimension_numbers = #tpu.dot_dimension_numbers<[1], [0], [0], [1], [0, 0, 1, 1], [], []>} : vector<8x32xf32>, vector<32x64xf32>, vector<8x64xf32> -> vector<8x64xf32>
      %c0_18 = arith.constant 0 : index
      %c0_19 = arith.constant 0 : index
      %35 = vector.load %arg8[%c0_18, %c0_19] : memref<8x64xf32, #tpu.memory_space<vmem>>, vector<8x64xf32>
      tpu.vector_store %arg8[%c0_18, %c0_19], %34 {strides = array<i32>} : memref<8x64xf32, #tpu.memory_space<vmem>>, vector<8x64xf32>,
      %c0_20 = arith.constant 0 : index
      %c0_21 = arith.constant 0 : index
      %36 = vector.load %arg6[%c0_20, %c0_21] : memref<8x192xf32, #tpu.memory_space<vmem>>, vector<8x192xf32>
      %c0_22 = arith.constant 0 : index
      %c0_23 = arith.constant 0 : index
      %37 = vector.load %arg7[%c0_22, %c0_23] : memref<8x192xf32, #tpu.memory_space<vmem>>, vector<8x192xf32>
      tpu.vector_store %arg7[%c0_22, %c0_23], %36 {strides = array<i32>} : memref<8x192xf32, #tpu.memory_space<vmem>>, vector<8x192xf32>,
    } else {
    }
    %3 = tpu.iota {dimensions = array<i32: 1>} : vector<128x8xi32>
    %c0 = arith.constant 0 : index
    %c0_1 = arith.constant 0 : index
    %4 = vector.load %arg4[%c0, %c0_1] : memref<128x1xi32, #tpu.memory_space<vmem>>, vector<128x1xi32>
    %5 = vector.broadcast %4 : vector<128x1xi32> to vector<128x8xi32>
    %6 = arith.cmpi eq, %5, %3 : vector<128x8xi32>
    %7 = arith.extui %6 : vector<128x8xi1> to vector<128x8xi32>
    %8 = arith.sitofp %7 : vector<128x8xi32> to vector<128x8xf32>
    %c0_2 = arith.constant 0 : index
    %c0_3 = arith.constant 0 : index
    %9 = vector.load %arg8[%c0_2, %c0_3] : memref<8x64xf32, #tpu.memory_space<vmem>>, vector<8x64xf32>
    %cst = arith.constant dense<0.000000e+00> : vector<128x64xf32>
    %10 = tpu.matmul %8, %9, %cst {dimension_numbers = #tpu.dot_dimension_numbers<[1], [0], [0], [1], [0, 0, 1, 1], [], []>} : vector<128x8xf32>, vector<8x64xf32>, vector<128x64xf32> -> vector<128x64xf32>
    %c0_4 = arith.constant 0 : index
    %c0_5 = arith.constant 0 : index
    %11 = vector.load %arg5[%c0_4, %c0_5] : memref<128x3xf32, #tpu.memory_space<vmem>>, vector<128x3xf32>
    %12 = vector.extract_strided_slice %11 {offsets = [0, 0], sizes = [128, 1], strides = [1, 1]} : vector<128x3xf32> to vector<128x1xf32>
    %13 = vector.broadcast %12 : vector<128x1xf32> to vector<128x64xf32>
    %14 = arith.mulf %10, %13 : vector<128x64xf32>
    %15 = vector.extract_strided_slice %11 {offsets = [0, 1], sizes = [128, 1], strides = [1, 1]} : vector<128x3xf32> to vector<128x1xf32>
    %16 = vector.broadcast %15 : vector<128x1xf32> to vector<128x64xf32>
    %17 = arith.mulf %10, %16 : vector<128x64xf32>
    %18 = vector.extract_strided_slice %11 {offsets = [0, 2], sizes = [128, 1], strides = [1, 1]} : vector<128x3xf32> to vector<128x1xf32>
    %19 = vector.broadcast %18 : vector<128x1xf32> to vector<128x64xf32>
    %20 = arith.mulf %10, %19 : vector<128x64xf32>
    %21 = tpu.concatenate %14, %17, %20 in 1 : vector<128x64xf32>, vector<128x64xf32>, vector<128x64xf32> -> vector<128x192xf32>
    %22 = tpu.iota {dimensions = array<i32: 0>} : vector<8x128xi32>
    %c0_6 = arith.constant 0 : index
    %c0_7 = arith.constant 0 : index
    %23 = vector.load %arg3[%c0_6, %c0_7] : memref<1x128xi32, #tpu.memory_space<vmem>>, vector<1x128xi32>
    %24 = vector.broadcast %23 : vector<1x128xi32> to vector<8x128xi32>
    %25 = arith.cmpi eq, %22, %24 : vector<8x128xi32>
    %26 = arith.extui %25 : vector<8x128xi1> to vector<8x128xi32>
    %27 = arith.sitofp %26 : vector<8x128xi32> to vector<8x128xf32>
    %c0_8 = arith.constant 0 : index
    %c0_9 = arith.constant 0 : index
    %28 = vector.load %arg7[%c0_8, %c0_9] : memref<8x192xf32, #tpu.memory_space<vmem>>, vector<8x192xf32>
    %cst_10 = arith.constant dense<0.000000e+00> : vector<8x192xf32>
    %29 = tpu.matmul %27, %21, %cst_10 {dimension_numbers = #tpu.dot_dimension_numbers<[1], [0], [0], [1], [0, 0, 1, 1], [], []>} : vector<8x128xf32>, vector<128x192xf32>, vector<8x192xf32> -> vector<8x192xf32>
    %30 = arith.addf %28, %29 : vector<8x192xf32>
    %c0_11 = arith.constant 0 : index
    %c0_12 = arith.constant 0 : index
    %31 = vector.load %arg7[%c0_11, %c0_12] : memref<8x192xf32, #tpu.memory_space<vmem>>, vector<8x192xf32>
    tpu.vector_store %arg7[%c0_11, %c0_12], %30 {strides = array<i32>} : memref<8x192xf32, #tpu.memory_space<vmem>>, vector<8x192xf32>,
    return
  }
  func.func @transform_0(%arg0: i32) -> (i32, i32) {
    %c0_i32 = arith.constant 0 : i32
    %c0_i32_0 = arith.constant 0 : i32
    %c0_i32_1 = arith.constant 0 : i32
    return %c0_i32, %c0_i32_0 : i32, i32
  }
  func.func @transform_1(%arg0: i32) -> (i32, i32) {
    %c0_i32 = arith.constant 0 : i32
    %c0_i32_0 = arith.constant 0 : i32
    %c0_i32_1 = arith.constant 0 : i32
    return %c0_i32, %c0_i32_0 : i32, i32
  }
  func.func @transform_2(%arg0: i32) -> (i32, i32) {
    %c0_i32 = arith.constant 0 : i32
    %c0_i32_0 = arith.constant 0 : i32
    return %c0_i32, %arg0 : i32, i32
  }
  func.func @transform_3(%arg0: i32) -> (i32, i32) {
    %c0_i32 = arith.constant 0 : i32
    %c0_i32_0 = arith.constant 0 : i32
    return %arg0, %c0_i32 : i32, i32
  }
  func.func @transform_4(%arg0: i32) -> (i32, i32) {
    %c0_i32 = arith.constant 0 : i32
    %c0_i32_0 = arith.constant 0 : i32
    return %arg0, %c0_i32 : i32, i32
  }
  func.func @transform_5(%arg0: i32) -> (i32, i32) {
    %c0_i32 = arith.constant 0 : i32
    %c0_i32_0 = arith.constant 0 : i32
    %c0_i32_1 = arith.constant 0 : i32
    return %c0_i32, %c0_i32_0 : i32, i32
  }
  func.func @transform_6(%arg0: i32) -> (i32, i32) {
    %c0_i32 = arith.constant 0 : i32
    %c0_i32_0 = arith.constant 0 : i32
    %c0_i32_1 = arith.constant 0 : i32
    return %c0_i32, %c0_i32_0 : i32, i32
  }
}

</mosaic_0001>

<bundles_post_ra>
// kernel: _dipole_update_impl.1
= control target key start
LH: loop header
LB: loop body
LE: loop exit
PB: predicated region body
PF: predicated region fallthrough
CT: control target
= control target key end

     0   :  { %v1069_v0 = vmov 0.0|0.0   ;;  %vm1070_vm0 = vmmov 0   ;;  %v1071_v4 = vmov 0.0   ;;  %v1072_v7 = vmov 0   ;;  %s1540_s1 = inlined_call_operand.vmem [shape: f32[32,64], index: 1, kind: input, shape index: {}]   ;;  %s1541_s3 = inlined_call_operand.vmem [shape: s32[128,1], index: 3, kind: input, shape index: {}]   ;;  %s1542_s0 = inlined_call_operand.vmem [shape: f32[8,32], index: 0, kind: input, shape index: {}]   ;;  %s1543_s4 = inlined_call_operand.vmem [shape: f32[128,3], index: 4, kind: input, shape index: {}]   ;;  %s1544_s5 = inlined_call_operand.vmem [shape: f32[8,192], index: 5, kind: input, shape index: {}, may-alias: {5,6}]   ;;  %s1545_s6 = inlined_call_operand.vmem [shape: f32[8,192], index: 6, kind: output, shape index: {}, may-alias: {5,6}]   ;;  %s1546_s2 = inlined_call_operand.vmem [shape: s32[1,128], index: 2, kind: input, shape index: {}]  }
   0x1   :  { %960 = vmatprep.subr.bf16.mxu0 %v1069_v0  ;;  %v28_v1 = vld [vmem:[%s1540_s1] sm:$0xff]  ;;  %v29_v2 = vld [vmem:[%s1540_s1 + $0x8] sm:$0xff]  ;;  %v30_v3 = vld [vmem:[%s1540_s1 + $0x10] sm:$0xff]  ;;  %931 = vmatprep.mubr.msk.f32.mxu0 %vm1070_vm0, %v1071_v4  ;;  %vm32_vm1 = vcmask 261120   ;;  %v1073_v26 = vmov 1   ;;  %v112_v34 = vlaneseq  ;;  %vm227_vm2 = vcmask 64512  }
   0x2   :  { %v961_v5 = vpack.c.bf16 %v29_v2, %v28_v1  ;;  %v31_v6 = vld [vmem:[%s1540_s1 + $0x18] sm:$0xff]  ;;  %1006 = vset.pattern.permute.xlu0 %v1072_v7  ;;  %v114_v8 = vld [vmem:[%s1541_s3] sm:$0xff]  ;;  %1007 = vset.pattern.permute.xlu1 %v1072_v7  ;;  %v116_v9 = vld [vmem:[%s1541_s3 + $0x10] sm:$0xff]  ;;  %v1074_v41 = vmov 2   ;;  %vm106_vm4 = vcmask 523264  }
   0x3   :  { %131 = vperm.xlu0 %1006, %v114_v8   ;;  %v964_v10 = vpack.c.bf16 %v31_v6, %v30_v3  ;;  %v115_v11 = vld [vmem:[%s1541_s3 + $0x8] sm:$0xff]  ;;  %137 = vperm.xlu1 %1007, %v116_v9   ;;  %v117_v12 = vld [vmem:[%s1541_s3 + $0x18] sm:$0xff]  ;;  %v27_v13 = vld [vmem:[%s1542_s0] sm:$0xff]  ;;  %v1211_v36 = vand.u32 127, %v112_v34 }
   0x4   :  { %962 = vmatpush3.bf16.msra.mxu0 %v961_v5  ;;  %v118_v14 = vld [vmem:[%s1541_s3 + $0x20] sm:$0xff]  ;;  %v119_v15 = vld [vmem:[%s1541_s3 + $0x28] sm:$0xff]  ;;  %v120_v16 = vld [vmem:[%s1541_s3 + $0x30] sm:$0xff] }
   0x5   :  { %963 = vmatprep.subr.bf16.mxu0 %v1069_v0  ;;  %v121_v17 = vld [vmem:[%s1541_s3 + $0x38] sm:$0xff]  ;;  %v122_v18 = vld [vmem:[%s1541_s3 + $0x40] sm:$0xff]  ;;  %v123_v19 = vld [vmem:[%s1541_s3 + $0x48] sm:$0xff] }
   0x6   :  { %v124_v20 = vld [vmem:[%s1541_s3 + $0x50] sm:$0xff]  ;;  %v125_v21 = vld [vmem:[%s1541_s3 + $0x58] sm:$0xff]  ;;  %v126_v22 = vld [vmem:[%s1541_s3 + $0x60] sm:$0xff] }
   0x7   :  { %134 = vperm.xlu0 %1006, %v115_v11   ;;  %140 = vperm.xlu1 %1007, %v117_v12   ;;  %v127_v23 = vld [vmem:[%s1541_s3 + $0x68] sm:$0xff]  ;;  %v128_v24 = vld [vmem:[%s1541_s3 + $0x70] sm:$0xff]  ;;  %v129_v25 = vld [vmem:[%s1541_s3 + $0x78] sm:$0xff] }
   0x8   :  { %965 = vmatpush3.bf16.msra.mxu0 %v964_v10  ;;  %v422_v27 = vld [vmem:[%s1543_s4 + $0x8] sm:$0xff]  ;;  %v423_v28 = vld [vmem:[%s1543_s4 + $0x10] sm:$0xff]  ;;  %v425_v29 = vld [vmem:[%s1543_s4 + $0x20] sm:$0xff] }
   0x9   :  { %v427_v30 = vld [vmem:[%s1543_s4 + $0x30] sm:$0xff]  ;;  %v429_v31 = vld [vmem:[%s1543_s4 + $0x40] sm:$0xff]  ;;  %v424_v40 = vld [vmem:[%s1543_s4 + $0x18] sm:$0xff] }
   0xa   :  { %v1196_v32 = vld [vmem:[%s1543_s4 + $0x50] sm:$0xff]  ;;  %v1202_v33 = vld [vmem:[%s1543_s4 + $0x60] sm:$0xff]  ;;  %v426_v42 = vld [vmem:[%s1543_s4 + $0x28] sm:$0xff] }
   0xb   :  { %932 = vmatmul.mubr.msk.f32.vlgmr.msra.gmra.mrb[0].mxu0 %vm32_vm1, %v27_v13  ;;  %143 = vperm.xlu0 %1006, %v118_v14   ;;  %v1208_v35 = vld [vmem:[%s1543_s4 + $0x70] sm:$0xff]  ;;  %v421_v38 = vld [vmem:[%s1543_s4] sm:$0xff]  ;;  %v1231_v43 = vld [vmem:[%s1543_s4 + $0x38] sm:$0xff] }
   0xc   :  { %146 = vperm.xlu1 %1007, %v119_v15   ;;  %v430_v44 = vld [vmem:[%s1543_s4 + $0x48] sm:$0xff]  ;;  %v1241_v45 = vld [vmem:[%s1543_s4 + $0x58] sm:$0xff] }
   0xd   :  { %v434_v46 = vld [vmem:[%s1543_s4 + $0x68] sm:$0xff]  ;;  %v1252_v47 = vld [vmem:[%s1543_s4 + $0x78] sm:$0xff]  ;;  %s1075_s4 = smov 64  }
   0xf   :  { %149 = vperm.xlu0 %1006, %v120_v16  }
  0x10   :  { %152 = vperm.xlu1 %1007, %v121_v17  }
  0x13   :  { %155 = vperm.xlu0 %1006, %v122_v18  }
  0x14   :  { %158 = vperm.xlu1 %1007, %v123_v19  }
  0x17   :  { %161 = vperm.xlu0 %1006, %v124_v20  }
  0x18   :  { %164 = vperm.xlu1 %1007, %v125_v21  }
  0x1b   :  { %167 = vperm.xlu0 %1006, %v126_v22  }
  0x1c   :  { %170 = vperm.xlu1 %1007, %v127_v23  }
  0x1f   :  { %173 = vperm.xlu0 %1006, %v128_v24  }
  0x20   :  { %176 = vperm.xlu1 %1007, %v129_v25  }
  0x23   :  { %1008 = vset.pattern.permute.xlu0 %v1073_v26 }
  0x24   :  { %1009 = vset.pattern.permute.xlu1 %v1073_v26  ;;  %534 = vperm.xlu0 %1008, %v421_v38  }
  0x25   :  { %538 = vperm.xlu1 %1009, %v422_v27  }
  0x28   :  { %546 = vperm.xlu0 %1008, %v424_v40  }
  0x29   :  { %542 = vperm.xlu1 %1009, %v423_v28  }
  0x2c   :  { %554 = vperm.xlu0 %1008, %v426_v42  }
  0x2d   :  { %550 = vperm.xlu1 %1009, %v425_v29  }
  0x30   :  { %562 = vperm.xlu0 %1008, %v1231_v43  }
  0x31   :  { %558 = vperm.xlu1 %1009, %v427_v30  }
  0x34   :  { %570 = vperm.xlu0 %1008, %v430_v44  }
  0x35   :  { %566 = vperm.xlu1 %1009, %v429_v31  }
  0x38   :  { %578 = vperm.xlu0 %1008, %v1241_v45  }
  0x39   :  { %574 = vperm.xlu1 %1009, %v1196_v32  }
  0x3c   :  { %586 = vperm.xlu0 %1008, %v434_v46  }
  0x3d   :  { %582 = vperm.xlu1 %1009, %v1202_v33  }
  0x40   :  { %594 = vperm.xlu0 %1008, %v1252_v47  }
  0x41   :  { %590 = vperm.xlu1 %1009, %v1208_v35  }
  0x44   :  { %1013 = vset.pattern.permute.xlu0 %v1074_v41 }
  0x45   :  { %1010 = vset.pattern.permute.xlu1 %v1072_v7  ;;  %622 = vperm.xlu0 %1013, %v423_v28  }
  0x46   :  { %439 = vperm.xlu1 %1010, %v421_v38  }
  0x49   :  { %1014 = vset.pattern.permute.xlu0 %v1072_v7 }
  0x4a   :  { %1011 = vset.pattern.permute.xlu1 %v1074_v41  ;;  %444 = vperm.xlu0 %1014, %v422_v27  }
  0x4b   :  { %614 = vperm.xlu1 %1011, %v421_v38  }
  0x4e   :  { %449 = vperm.xlu0 %1014, %v423_v28  }
  0x4f   :  { %618 = vperm.xlu1 %1011, %v422_v27  }
  0x52   :  { %464 = vperm.xlu0 %1014, %v426_v42  }
  0x53   :  { %1012 = vset.pattern.permute.xlu1 %v1072_v7 }
  0x54   :  { %454 = vperm.xlu1 %1012, %v424_v40  }
  0x56   :  { %474 = vperm.xlu0 %1014, %v1231_v43  }
  0x58   :  { %1015 = vset.pattern.permute.xlu1 %v1074_v41 }
  0x59   :  { %626 = vperm.xlu1 %1015, %v424_v40  }
  0x5a   :  { %484 = vperm.xlu0 %1014, %v430_v44  }
  0x5d   :  { %1016 = vset.pattern.permute.xlu1 %v1072_v7 }
  0x5e   :  { %459 = vperm.xlu1 %1016, %v425_v29   ;;  %494 = vperm.xlu0 %1014, %v1241_v45  }
  0x62   :  { %1017 = vset.pattern.permute.xlu1 %v1074_v41  ;;  %504 = vperm.xlu0 %1014, %v434_v46  }
  0x63   :  { %630 = vperm.xlu1 %1017, %v425_v29  }
  0x67   :  { %634 = vperm.xlu1 %1017, %v426_v42  }
  0x6b   :  { %1018 = vset.pattern.permute.xlu1 %v1072_v7 }
  0x6c   :  { %469 = vperm.xlu1 %1018, %v427_v30  }
  0x70   :  { %1019 = vset.pattern.permute.xlu1 %v1074_v41 }
  0x71   :  { %638 = vperm.xlu1 %1019, %v427_v30  }
  0x75   :  { %1020 = vset.pattern.permute.xlu1 %v1072_v7 }
  0x76   :  { %479 = vperm.xlu1 %1020, %v429_v31  }
  0x7a   :  { %1021 = vset.pattern.permute.xlu1 %v1074_v41 }
  0x7b   :  { %646 = vperm.xlu1 %1021, %v429_v31  }
  0x7f   :  { %650 = vperm.xlu1 %1021, %v430_v44  }
  0x82   :  { %v132_v37 = vpop.permute.xlu0 %131  ;;  %v138_v48 = vpop.permute.xlu1 %137 }
  0x83   :  { %vm178_vm3 = vcmp.eq.s32.totalorder %v132_v37, %v1211_v36  ;;  %1022 = vset.pattern.permute.xlu1 %v1072_v7  ;;  %vm180_vm5 = vcmp.eq.s32.totalorder %v138_v48, %v1211_v36 }
  0x84   :  { %v866_v39 = vsel %vm178_vm3, 1.0, %v1071_v4  ;;  %489 = vperm.xlu1 %1022, %v1196_v32   ;;  %v868_v58 = vsel %vm180_vm5, 1.0, %v1071_v4 }
  0x85   :  { %936 = vmatprep.mubr.msk.f32.mxu1 %vm227_vm2, %v866_v39 }
  0x86   :  { %v135_v49 = vpop.permute.xlu0 %134  ;;  %v141_v50 = vpop.permute.xlu1 %140 }
  0x87   :  { %vm179_vm6 = vcmp.eq.s32.totalorder %v135_v49, %v1211_v36  ;;  %vm181_vm7 = vcmp.eq.s32.totalorder %v141_v50, %v1211_v36 }
  0x88   :  { %1023 = vset.pattern.permute.xlu1 %v1074_v41  ;;  %v867_v59 = vsel %vm179_vm6, 1.0, %v1071_v4  ;;  %v869_v61 = vsel %vm181_vm7, 1.0, %v1071_v4 }
  0x89   :  { %654 = vperm.xlu1 %1023, %v1196_v32  }
  0x8a   :  { %v144_v51 = vpop.permute.xlu0 %143 }
  0x8b   :  { %v147_v54 = vpop.permute.xlu1 %146  ;;  %vm182_vm8 = vcmp.eq.s32.totalorder %v144_v51, %v1211_v36 }
  0x8c   :  { %v870_v63 = vsel %vm182_vm8, 1.0, %v1071_v4  ;;  %vm183_vm9 = vcmp.eq.s32.totalorder %v147_v54, %v1211_v36 }
  0x8d   :  { %1024 = vset.pattern.permute.xlu1 %v1072_v7  ;;  %v871_v1 = vsel %vm183_vm9, 1.0, %v1071_v4 }
  0x8e   :  { %499 = vperm.xlu1 %1024, %v1202_v33   ;;  %v150_v55 = vpop.permute.xlu0 %149 }
  0x8f   :  { %v153_v56 = vpop.permute.xlu1 %152  ;;  %vm184_vm10 = vcmp.eq.s32.totalorder %v150_v55, %v1211_v36 }
  0x90   :  { %v872_v2 = vsel %vm184_vm10, 1.0, %v1071_v4  ;;  %vm185_vm11 = vcmp.eq.s32.totalorder %v153_v56, %v1211_v36 }
  0x91   :  { %v873_v5 = vsel %vm185_vm11, 1.0, %v1071_v4 }
  0x92   :  { %1025 = vset.pattern.permute.xlu1 %v1074_v41  ;;  %v156_v60 = vpop.permute.xlu0 %155 }
  0x93   :  { %662 = vperm.xlu1 %1025, %v1202_v33   ;;  %v159_v62 = vpop.permute.xlu1 %158  ;;  %vm186_vm12 = vcmp.eq.s32.totalorder %v156_v60, %v1211_v36 }
  0x94   :  { %v874_v6 = vsel %vm186_vm12, 1.0, %v1071_v4  ;;  %vm187_vm13 = vcmp.eq.s32.totalorder %v159_v62, %v1211_v36 }
  0x95   :  { %v875_v8 = vsel %vm187_vm13, 1.0, %v1071_v4 }
  0x96   :  { %v162_v0 = vpop.permute.xlu0 %161 }
  0x97   :  { %666 = vperm.xlu1 %1025, %v434_v46   ;;  %v165_v3 = vpop.permute.xlu1 %164  ;;  %vm188_vm14 = vcmp.eq.s32.totalorder %v162_v0, %v1211_v36 }
  0x98   :  { %v876_v10 = vsel %vm188_vm14, 1.0, %v1071_v4  ;;  %vm189_vm15 = vcmp.eq.s32.totalorder %v165_v3, %v1211_v36 }
  0x99   :  { %v877_v12 = vsel %vm189_vm15, 1.0, %v1071_v4 }
  0x9b   :  { %1036 = vset.pattern.permute.xlu1 %v1072_v7  ;;  %v168_v7 = vpop.permute.xlu0 %167  ;;  %v171_v9 = vpop.permute.xlu1 %170 }
  0x9c   :  { %vm190_vm0 = vcmp.eq.s32.totalorder %v168_v7, %v1211_v36  ;;  %vm191_vm1 = vcmp.eq.s32.totalorder %v171_v9, %v1211_v36 }
  0x9d   :  { %v878_v13 = vsel %vm190_vm0, 1.0, %v1071_v4  ;;  %v879_v15 = vsel %vm191_vm1, 1.0, %v1071_v4 }
  0x9f   :  { %v174_v11 = vpop.permute.xlu0 %173  ;;  %v177_v14 = vpop.permute.xlu1 %176 }
  0xa0   :  { %vm192_vm3 = vcmp.eq.s32.totalorder %v174_v11, %v1211_v36  ;;  %vm193_vm5 = vcmp.eq.s32.totalorder %v177_v14, %v1211_v36 }
  0xa1   :  { %v880_v16 = vsel %vm192_vm3, 1.0, %v1071_v4  ;;  %v881_v17 = vsel %vm193_vm5, 1.0, %v1071_v4 }
  0xa3   :  { %v535_v32 = vpop.permute.xlu0 %534 }
  0xa4   :  { %v539_v18 = vpop.permute.xlu1 %538 }
  0xa7   :  { %v547_v36 = vpop.permute.xlu0 %546 }
  0xa8   :  { %v543_v19 = vpop.permute.xlu1 %542 }
  0xab   :  { %v555_v38 = vpop.permute.xlu0 %554 }
  0xac   :  { %v551_v20 = vpop.permute.xlu1 %550 }
  0xaf   :  { %v563_v40 = vpop.permute.xlu0 %562 }
  0xb0   :  { %v1320_v21 = vpop.permute.xlu1 %558 }
  0xb3   :  { %v571_v44 = vpop.permute.xlu0 %570 }
  0xb4   :  { %v1322_v22 = vpop.permute.xlu1 %566 }
  0xb7   :  { %v579_v48 = vpop.permute.xlu0 %578 }
  0xb8   :  { %v1324_v23 = vpop.permute.xlu1 %574 }
  0xbb   :  { %v1340_v50 = vpop.permute.xlu0 %586 }
  0xbc   :  { %v1326_v24 = vpop.permute.xlu1 %582 }
  0xc0   :  { %v1328_v25 = vpop.permute.xlu1 %590 }
  0xc5   :  { %v1330_v26 = vpop.permute.xlu1 %439 }
  0xca   :  { %v615_v27 = vpop.permute.xlu1 %614 }
  0xce   :  { %v619_v28 = vpop.permute.xlu1 %618 }
  0xd3   :  { %v1332_v29 = vpop.permute.xlu1 %454 }
  0xde   :  { %v102_v52 = vpop.f32.mrb[0].mxu0 }
  0xdf   :  { %107 = vst.msk [vmem:[#allocation2] sm:$0xff] %vm106_vm4, %v102_v52  ;;  %v933_v53 = vpop.f32.mrb[1].mxu0  ;;  %v1344_v52 = vpop.permute.xlu0 %594 }
  0xe6   :  { %v226_v57 = vld [vmem:[#allocation2] sm:$0xff] }
  0xe7   :  { %934 = vmatprep.subr.mxu1 %v226_v57 }
  0xe8   :  { %935 = vmatpush3.msra.mxu1 %v226_v57 }
  0xe9   :  { %937 = vmatmul.mubr.msk.f32.vlgmr.msra.gmra.mrb[0].mxu1 %vm227_vm2, %v867_v59 }
  0xea   :  { %939 = vmatprep.mubr.msk.f32.mxu1 %vm227_vm2, %v868_v58 }
  0xed   :  { %940 = vmatmul.mubr.msk.f32.gmra.mrb[2].mxu1 %vm227_vm2, %v869_v61 }
  0xee   :  { %942 = vmatprep.mubr.msk.f32.mxu1 %vm227_vm2, %v870_v63  ;;  %v623_v63 = vpop.permute.xlu0 %622 }
  0xf1   :  { %943 = vmatmul.mubr.msk.f32.gmra.mrb[4].mxu1 %vm227_vm2, %v871_v1 }
  0xf2   :  { %945 = vmatprep.mubr.msk.f32.mxu1 %vm227_vm2, %v872_v2 }
  0xf5   :  { %946 = vmatmul.mubr.msk.f32.gmra.mrb[6].mxu1 %vm227_vm2, %v873_v5 }
  0xf6   :  { %948 = vmatprep.mubr.msk.f32.mxu1 %vm227_vm2, %v874_v6 }
  0xf9   :  { %949 = vmatmul.mubr.msk.f32.gmra.mrb[8].mxu1 %vm227_vm2, %v875_v8 }
  0xfa   :  { %951 = vmatprep.mubr.msk.f32.mxu1 %vm227_vm2, %v876_v10 }
  0xfd   :  { %952 = vmatmul.mubr.msk.f32.gmra.mrb[10].mxu1 %vm227_vm2, %v877_v12 }
  0xfe   :  { %954 = vmatprep.mubr.msk.f32.mxu1 %vm227_vm2, %v878_v13 }
 0x101   :  { %955 = vmatmul.mubr.msk.f32.gmra.mrb[12].mxu1 %vm227_vm2, %v879_v15 }
 0x102   :  { %957 = vmatprep.mubr.msk.f32.mxu1 %vm227_vm2, %v880_v16 }
 0x105   :  { %958 = vmatmul.mubr.msk.f32.gmra.mrb[14].mxu1 %vm227_vm2, %v881_v17 }
 0x106   :  { %850 = vmatprep.mubr.f32.mxu1 %v1071_v4  ;;  %v627_v4 = vpop.permute.xlu1 %626 }
 0x10a   :  { %v1334_v30 = vpop.permute.xlu1 %459 }
 0x10e   :  { %v631_v31 = vpop.permute.xlu1 %630 }
 0x112   :  { %v635_v33 = vpop.permute.xlu1 %634 }
 0x116   :  { %v470_v37 = vpop.permute.xlu1 %469 }
 0x11a   :  { %v1336_v39 = vpop.permute.xlu1 %638 }
 0x11e   :  { %v1338_v42 = vpop.permute.xlu1 %479 }
 0x122   :  { %v647_v46 = vpop.permute.xlu1 %646 }
 0x126   :  { %v651_v49 = vpop.permute.xlu1 %650 }
 0x12a   :  { %v1342_v51 = vpop.permute.xlu1 %489 }
 0x12e   :  { %v1356_v62 = vpop.permute.xlu1 %654 }
 0x132   :  { %v1385_v14 = vpop.permute.xlu1 %499 }
 0x1bc   :  { %v1346_v53 = vpop.f32.mrb[0].mxu1 }
 0x1bd   :  { %v598_v54 = vmul.f32 %v1346_v53, %v539_v18  ;;  %v678_v55 = vmul.f32 %v1346_v53, %v619_v28  ;;  %v1350_v56 = vpop.f32.mrb[1].mxu1 }
 0x1be   :  { %v597_v57 = vmul.f32 %v535_v32, %v1350_v56  ;;  %v677_v58 = vmul.f32 %v615_v27, %v1350_v56 }
 0x1c0   :  { %v1354_v59 = vpop.f32.mrb[2].mxu1  ;;  %v966_v60 = vpack.c.bf16 %v678_v55, %v677_v58  ;;  %v1026_v61 = vpack.i.bf16 %v598_v54, %v597_v57 }
 0x1c1   :  { %v600_v0 = vmul.f32 %v1354_v59, %v547_v36  ;;  %v1360_v1 = vmul.f32 %v1354_v59, %v627_v4  ;;  %v1362_v2 = vpop.f32.mrb[3].mxu1 }
 0x1c2   :  { %v599_v3 = vmul.f32 %v543_v19, %v1362_v2  ;;  %v1366_v5 = vmul.f32 %v623_v63, %v1362_v2  ;;  %967 = vmatprep.subr.bf16.mxu1 %v966_v60  ;;  %1027 = vrot.lane.b32.xlu0 %v1026_v61, %s1075_s4 }
 0x1c4   :  { %v1369_v6 = vpop.f32.mrb[4].mxu1  ;;  %v1031_v7 = vpack.i.bf16 %v600_v0, %v599_v3  ;;  %v970_v8 = vpack.c.bf16 %v1360_v1, %v1366_v5  ;;  %v109_v0 = vld [vmem:[%s1544_s5 + $0x8] sm:$0xff] }
 0x1c5   :  { %v602_v9 = vmul.f32 %v1369_v6, %v555_v38  ;;  %v1375_v10 = vmul.f32 %v1369_v6, %v635_v33  ;;  %v1377_v11 = vpop.f32.mrb[5].mxu1  ;;  %111 = vst.msk [vmem:[%s1545_s6 + $0x8] sm:$0xff] %vm106_vm4, %v109_v0 }
 0x1c6   :  { %v601_v12 = vmul.f32 %v551_v20, %v1377_v11  ;;  %v1381_v13 = vmul.f32 %v631_v31, %v1377_v11  ;;  %514 = vperm.xlu0 %1014, %v1252_v47   ;;  %1032 = vrot.lane.b32.xlu1 %v1031_v7, %s1075_s4  ;;  %v663_v31 = vpop.permute.xlu1 %662 }
 0x1c8   :  { %v1387_v15 = vpop.f32.mrb[6].mxu1  ;;  %v1038_v16 = vpack.i.bf16 %v602_v9, %v601_v12  ;;  %v974_v17 = vpack.c.bf16 %v1375_v10, %v1381_v13  ;;  %v521_v10 = vmul.f32 %v1334_v30, %v1377_v11 }
 0x1c9   :  { %v604_v18 = vmul.f32 %v1387_v15, %v563_v40  ;;  %v1392_v19 = vpop.f32.mrb[7].mxu1 }
 0x1ca   :  { %v1395_v20 = vmul.f32 %v470_v37, %v1392_v19  ;;  %v603_v27 = vmul.f32 %v1320_v21, %v1392_v19  ;;  %1037 = vset.pattern.permute.xlu0 %v1074_v41  ;;  %509 = vperm.xlu1 %1036, %v1208_v35  }
 0x1cb   :  { %642 = vperm.xlu0 %1037, %v1231_v43  }
 0x1cc   :  { %v1402_v28 = vpop.f32.mrb[8].mxu1  ;;  %v1043_v4 = vpack.i.bf16 %v604_v18, %v603_v27  ;;  %v517_v27 = vmul.f32 %v1330_v26, %v1350_v56 }
 0x1cd   :  { %v606_v32 = vmul.f32 %v1402_v28, %v571_v44  ;;  %v1406_v33 = vmul.f32 %v1402_v28, %v651_v49  ;;  %v1408_v36 = vpop.f32.mrb[9].mxu1 }
 0x1ce   :  { %v605_v21 = vmul.f32 %v1322_v22, %v1408_v36  ;;  %v1413_v37 = vmul.f32 %v647_v46, %v1408_v36  ;;  %1044 = vrot.lane.b32.xlu1 %v1043_v4, %s1075_s4  ;;  %v667_v46 = vpop.permute.xlu1 %666 }
 0x1cf   :  { %1039 = vrot.lane.b32.xlu0 %v1038_v16, %s1075_s4  ;;  %1048 = vset.pattern.permute.xlu1 %v1074_v41 }
 0x1d0   :  { %v1418_v43 = vpop.f32.mrb[10].mxu1  ;;  %v1049_v38 = vpack.i.bf16 %v606_v32, %v605_v21  ;;  %v982_v40 = vpack.c.bf16 %v1406_v33, %v1413_v37 }
 0x1d1   :  { %v608_v44 = vmul.f32 %v1418_v43, %v579_v48  ;;  %v1423_v49 = vpop.f32.mrb[11].mxu1 }
 0x1d2   :  { %v607_v22 = vmul.f32 %v1324_v23, %v1423_v49  ;;  %670 = vperm.xlu1 %1048, %v1208_v35  }
 0x1d3   :  { %658 = vperm.xlu0 %1037, %v1241_v45  }
 0x1d4   :  { %v1429_v54 = vpop.f32.mrb[12].mxu1  ;;  %v1054_v41 = vpack.i.bf16 %v608_v44, %v607_v22  ;;  %v520_v22 = vmul.f32 %v1354_v59, %v1332_v29 }
 0x1d5   :  { %v610_v55 = vmul.f32 %v1429_v54, %v1340_v50  ;;  %v1434_v57 = vmul.f32 %v1429_v54, %v667_v46  ;;  %v1436_v48 = vpop.f32.mrb[13].mxu1 }
 0x1d6   :  { %v609_v58 = vmul.f32 %v1326_v24, %v1436_v48  ;;  %v1441_v23 = vmul.f32 %v663_v31, %v1436_v48  ;;  %1055 = vrot.lane.b32.xlu1 %v1054_v41, %s1075_s4 }
 0x1d7   :  { %1050 = vrot.lane.b32.xlu0 %v1049_v38, %s1075_s4 }
 0x1d8   :  { %v1445_v35 = vpop.f32.mrb[14].mxu1  ;;  %v1059_v45 = vpack.i.bf16 %v610_v55, %v609_v58  ;;  %v990_v50 = vpack.c.bf16 %v1434_v57, %v1441_v23  ;;  %v683_v58 = vmul.f32 %v1336_v39, %v1392_v19  ;;  %v785_v57 = vld [vmem:[%s1545_s6 + $0x8] sm:$0xff] }
 0x1d9   :  { %v612_v60 = vmul.f32 %v1445_v35, %v1344_v52  ;;  %v1451_v61 = vpop.f32.mrb[15].mxu1  ;;  %v445_v52 = vpop.permute.xlu0 %444 }
 0x1da   :  { %v611_v24 = vmul.f32 %v1328_v25, %v1451_v61  ;;  %1060 = vrot.lane.b32.xlu1 %v1059_v45, %s1075_s4  ;;  %v518_v18 = vmul.f32 %v1346_v53, %v445_v52 }
 0x1db   :  { %674 = vperm.xlu0 %1037, %v1252_v47  }
 0x1dc   :  { %v1064_v63 = vpack.i.bf16 %v612_v60, %v611_v24 }
 0x1dd   :  { %v450_v3 = vpop.permute.xlu0 %449 }
 0x1de   :  { %v519_v46 = vmul.f32 %v450_v3, %v1362_v2 }
 0x1df   :  { %1065 = vrot.lane.b32.xlu0 %v1064_v63, %s1075_s4 }
 0x1e1   :  { %v465_v7 = vpop.permute.xlu0 %464 }
 0x1e2   :  { %v522_v0 = vmul.f32 %v1369_v6, %v465_v7  ;;  %v687_v6 = vmul.f32 %v1356_v62, %v1423_v49 }
 0x1e5   :  { %v475_v25 = vpop.permute.xlu0 %474 }
 0x1e6   :  { %v524_v63 = vmul.f32 %v1387_v15, %v475_v25 }
 0x1e9   :  { %v485_v9 = vpop.permute.xlu0 %484 }
 0x1ed   :  { %v495_v12 = vpop.permute.xlu0 %494 }
 0x1f1   :  { %v505_v16 = vpop.permute.xlu0 %504 }
 0x234   :  { %v1028_v47 = vpop.permute.xlu0 %1027 }
 0x235   :  { %v1030_v4 = vunpack.i.h.bf16 %v1028_v47  ;;  %v1029_v31 = vunpack.i.l.bf16 %v1028_v47 }
 0x237   :  { %v759_v32 = vsel %vm106_vm4, %v518_v18, %v1030_v4  ;;  %v758_v21 = vsel %vm106_vm4, %v517_v27, %v1029_v31  ;;  %v528_v27 = vmul.f32 %v1418_v43, %v495_v12 }
 0x238   :  { %v968_v38 = vpack.c.bf16 %v759_v32, %v758_v21  ;;  %v1033_v44 = vpop.permute.xlu1 %1032  ;;  %v526_v21 = vmul.f32 %v1402_v28, %v485_v9 }
 0x239   :  { %v1035_v41 = vunpack.i.h.bf16 %v1033_v44  ;;  %v1034_v55 = vunpack.i.l.bf16 %v1033_v44 }
 0x23a   :  { %969 = vmatpush1.bf16.msra.mxu1 %v968_v38  ;;  %v525_v38 = vmul.f32 %v1338_v42, %v1408_v36  ;;  %v529_v42 = vmul.f32 %v1385_v14, %v1436_v48 }
 0x23b   :  { %v761_v53 = vsel %vm106_vm4, %v520_v22, %v1035_v41  ;;  %v760_v26 = vsel %vm106_vm4, %v519_v46, %v1034_v55  ;;  %971 = vmatprep.subr.bf16.mxu1 %v970_v8 }
 0x23c   :  { %v972_v56 = vpack.c.bf16 %v761_v53, %v760_v26 }
 0x23e   :  { %973 = vmatpush1.bf16.msra.mxu1 %v972_v56 }
 0x23f   :  { %975 = vmatprep.subr.bf16.mxu1 %v974_v17 }
 0x245   :  { %v515_v29 = vpop.permute.xlu0 %514 }
 0x249   :  { %v510_v59 = vpop.permute.xlu1 %509 }
 0x24a   :  { %v643_v2 = vpop.permute.xlu0 %642  ;;  %v531_v14 = vmul.f32 %v510_v59, %v1451_v61 }
 0x24b   :  { %v684_v45 = vmul.f32 %v1387_v15, %v643_v2 }
 0x24d   :  { %v978_v60 = vpack.c.bf16 %v684_v45, %v683_v58  ;;  %v1045_v24 = vpop.permute.xlu1 %1044 }
 0x24e   :  { %v1047_v1 = vunpack.i.h.bf16 %v1045_v24  ;;  %v1046_v5 = vunpack.i.l.bf16 %v1045_v24  ;;  %v1040_v8 = vpop.permute.xlu0 %1039  ;;  %v775_v24 = vshrl.u32 %v112_v34, 7 }
 0x24f   :  { %v1042_v13 = vunpack.i.h.bf16 %v1040_v8  ;;  %v1041_v17 = vunpack.i.l.bf16 %v1040_v8 }
 0x250   :  { %v765_v52 = vsel %vm106_vm4, %v524_v63, %v1047_v1  ;;  %v764_v39 = vsel %vm106_vm4, %v1395_v20, %v1046_v5  ;;  %v527_v20 = vmul.f32 %v1342_v51, %v1423_v49 }
 0x251   :  { %v980_v19 = vpack.c.bf16 %v765_v52, %v764_v39  ;;  %v763_v3 = vsel %vm106_vm4, %v522_v0, %v1042_v13  ;;  %v762_v15 = vsel %vm106_vm4, %v521_v10, %v1041_v17  ;;  %v671_v25 = vpop.permute.xlu1 %670 }
 0x252   :  { %v976_v47 = vpack.c.bf16 %v763_v3, %v762_v15  ;;  %v659_v18 = vpop.permute.xlu0 %658  ;;  %v691_v53 = vmul.f32 %v671_v25, %v1451_v61  ;;  %v1076_v61 = vmov 1.0  }
 0x253   :  { %v688_v30 = vmul.f32 %v1418_v43, %v659_v18  ;;  %v530_v43 = vmul.f32 %v1429_v54, %v505_v16 }
 0x254   :  { %977 = vmatpush1.bf16.msra.mxu1 %v976_v47 }
 0x255   :  { %v986_v11 = vpack.c.bf16 %v688_v30, %v687_v6  ;;  %979 = vmatprep.subr.bf16.mxu1 %v978_v60  ;;  %v1056_v7 = vpop.permute.xlu1 %1055 }
 0x256   :  { %v1058_v4 = vunpack.i.h.bf16 %v1056_v7  ;;  %v1057_v31 = vunpack.i.l.bf16 %v1056_v7  ;;  %v1051_v32 = vpop.permute.xlu0 %1050 }
 0x257   :  { %v1053_v62 = vunpack.i.h.bf16 %v1051_v32  ;;  %v1052_v44 = vunpack.i.l.bf16 %v1051_v32 }
 0x258   :  { %v769_v22 = vsel %vm106_vm4, %v528_v27, %v1058_v4  ;;  %v768_v46 = vsel %vm106_vm4, %v527_v20, %v1057_v31  ;;  %981 = vmatpush1.bf16.msra.mxu1 %v980_v19 }
 0x259   :  { %v988_v12 = vpack.c.bf16 %v769_v22, %v768_v46  ;;  %v767_v51 = vsel %vm106_vm4, %v526_v21, %v1053_v62  ;;  %v766_v49 = vsel %vm106_vm4, %v525_v38, %v1052_v44  ;;  %983 = vmatprep.subr.bf16.mxu1 %v982_v40  ;;  %v1061_v28 = vpop.permute.xlu1 %1060  ;;  %v532_v40 = vmul.f32 %v1445_v35, %v515_v29  ;;  %v108_v29 = vld [vmem:[%s1544_s5] sm:$0xff] }
 0x25a   :  { %v984_v36 = vpack.c.bf16 %v767_v51, %v766_v49  ;;  %v1063_v9 = vunpack.i.h.bf16 %v1061_v28  ;;  %v1062_v41 = vunpack.i.l.bf16 %v1061_v28  ;;  %v675_v55 = vpop.permute.xlu0 %674 }
 0x25b   :  { %v692_v54 = vmul.f32 %v1445_v35, %v675_v55  ;;  %v898_v35 = vld [vmem:[%s1546_s2] ss:$0 sm:$0xff] }
 0x25c   :  { %v771_v16 = vsel %vm106_vm4, %v530_v43, %v1063_v9  ;;  %v770_v26 = vsel %vm106_vm4, %v529_v42, %v1062_v41  ;;  %985 = vmatpush1.bf16.msra.mxu1 %v984_v36  ;;  %vm781_vm2 = vcmp.eq.s32.totalorder %v775_v24, %v898_v35 }
 0x25d   :  { %v992_v56 = vpack.c.bf16 %v771_v16, %v770_v26  ;;  %v994_v33 = vpack.c.bf16 %v692_v54, %v691_v53  ;;  %987 = vmatprep.subr.bf16.mxu1 %v986_v11 }
 0x25e   :  { %v1066_v37 = vpop.permute.xlu0 %1065 }
 0x25f   :  { %v1068_v48 = vunpack.i.h.bf16 %v1066_v37  ;;  %v1067_v2 = vunpack.i.l.bf16 %v1066_v37 }
 0x260   :  { %989 = vmatpush1.bf16.msra.mxu1 %v988_v12 }
 0x261   :  { %v773_v58 = vsel %vm106_vm4, %v532_v40, %v1068_v48  ;;  %v772_v45 = vsel %vm106_vm4, %v531_v14, %v1067_v2  ;;  %991 = vmatprep.subr.bf16.mxu1 %v990_v50 }
 0x262   :  { %v996_v60 = vpack.c.bf16 %v773_v58, %v772_v45 }
 0x264   :  { %993 = vmatpush1.bf16.msra.mxu1 %v992_v56 }
 0x265   :  { %995 = vmatprep.subr.bf16.mxu1 %v994_v33 }
 0x268   :  { %997 = vmatpush1.bf16.msra.mxu1 %v996_v60 }
 0x26b   :  { %900 = vmatmul.mubr.msk.f32.vlgmr.msra.gmra.mrb[16].mxu1 %vm781_vm2, %v1076_v61 }
 0x33e   :  { %v852_v23 = vpop.f32.mrb[16].mxu1 }
 0x33f   :  { %v857_v50 = vadd.f32 %v852_v23, %v108_v29  ;;  %v854_v34 = vpop.f32.mrb[17].mxu1 }
 0x340   :  { %v858_v59 = vadd.f32 %v854_v34, %v785_v57 }
 0x341   :  { %859 = vst [vmem:[%s1545_s6] sm:$0xff] %v857_v50 }
 0x342   :  { %860 = vst.msk [vmem:[%s1545_s6 + $0x8] sm:$0xff] %vm106_vm4, %v858_v59 }

</bundles_post_ra>
